<compile_context>
chip_gen: v7x
topology: tpu7x:2x2x1
jax: 0.10.0
libtpu: 0.0.40
codegen_flags: <defaults>
</compile_context>

<pallas_src>
import functools
from typing import NamedTuple

import jax
import jax.numpy as jnp
from jax.experimental import pallas as pl
from jax.experimental.pallas import tpu as pltpu


# ---------------------------------------------------------------------------
# Helpers
# ---------------------------------------------------------------------------

def _round_up(x, m):
    return ((x + m - 1) // m) * m


@functools.lru_cache(maxsize=1)
def _vmem_budget_bytes():
    """Generation-aware VMEM budget used for tile sizing (conservative)."""
    try:
        info = pltpu.get_tpu_info()
        for name in ("vmem_capacity_bytes", "vmem_bytes", "vmem_size_bytes"):
            cap = getattr(info, name, None)
            if cap:
                # ~1/3 of physical VMEM, capped at 32 MiB:
                #   v5e/v6e (128 MiB) -> 32 MiB, v7x (64 MiB / TC) -> ~21 MiB.
                return int(min(int(cap) // 3, 32 * 1024 * 1024))
    except Exception:
        pass
    # Fallback fits every generation's *default* scoped VMEM (v5e = 16 MiB).
    return 12 * 1024 * 1024


def _vmem_limit_bytes(footprint):
    """Explicit Mosaic scoped-VMEM limit: 2x estimated footprint,
    floor 16 MiB, cap 48 MiB (safe under v7x's 64 MiB physical VMEM)."""
    return int(min(max(2 * footprint, 16 * 1024 * 1024), 48 * 1024 * 1024))


# ---------------------------------------------------------------------------
# Kernels
# ---------------------------------------------------------------------------

def _linear_kernel(x_ref, w_ref, b_ref, o_ref, acc_ref):
    """General tiled linear; one (batch-tile, K-tile) grid step.

    x_ref:   (TB, TK)     VMEM  -- batch tile x K tile of the input
    w_ref:   (TK, OUT_P)  VMEM  -- pre-transposed, lane-padded weight tile
    b_ref:   (1, OUT_S)   VMEM  -- bias (OUT_S = stored output width)
    o_ref:   (TB, OUT_S)  VMEM  -- output tile (written on the last K step)
    acc_ref: (TB, OUT_P)  VMEM  -- f32 accumulator scratch
    """
    k = pl.program_id(1)

    @pl.when(k == 0)
    def _():
        acc_ref[...] = jnp.zeros_like(acc_ref)

    acc_ref[...] += jnp.dot(x_ref[...], w_ref[...],
                            preferred_element_type=jnp.float32)

    @pl.when(k == pl.num_programs(1) - 1)
    def _():
        nf = o_ref.shape[-1]
        acc = acc_ref[...]
        o_ref[...] = (acc[:, :nf] + b_ref[...]).astype(o_ref.dtype)


def _scalar_affine_kernel(w_ref, b_ref, x_ref, o_ref):
    """Fast path for in_features == out_features == 1 (the chapter's case).

    w_ref, b_ref: (1, 1) scalars in SMEM.
    x_ref, o_ref: (TR, 128) lane-dense slab tiles in VMEM.
    Pure VPU broadcast multiply-add; no MXU pass for a 1x1 matmul.
    """
    o_ref[...] = x_ref[...] * w_ref[0, 0] + b_ref[0, 0]


# ---------------------------------------------------------------------------
# Parameter preparation (runs ONCE, at module init — not per forward)
# ---------------------------------------------------------------------------

class _LinearCfg(NamedTuple):
    in_f: int
    out_f: int
    in_p: int          # K padded to tk * num_k
    out_p: int         # MXU/lane padding of out dim (multiple of 128)
    out_s: int         # stored output width (out_p if padded store else out_f)
    tk: int
    num_k: int
    slice_out: bool    # post-kernel slice needed
    compute_dtype: str


def prepare_linear_params(weight, bias, compute_dtype=jnp.float32):
    """One-time prep: transpose weight to (in, out) so the MXU is fed directly,
    lane-pad the out dim, pick K tiling, and optionally cast to bf16."""
    out_f, in_f = weight.shape
    budget = _vmem_budget_bytes()

    out_p = _round_up(out_f, 128)
    # Padded (lane-dense) store only pays off once out_f is large; tiny out_f
    # writes the exact (B, out_f) shape and skips both the inflated writeback
    # and the post-kernel slice.
    store_padded = (out_f % 128 == 0) or (out_f >= 128)
    out_s = out_p if store_padded else out_f
    slice_out = store_padded and (out_p != out_f)

    # K tiling: keep the whole (in_f, out_p) weight resident when it (with its
    # pipeline double-buffer) fits comfortably; otherwise split K into
    # 128-multiple chunks and accumulate in VMEM scratch.
    if 2 * in_f * out_p * 4 <= 0.4 * budget:
        tk, num_k = in_f, 1
    else:
        tk = 128
        while (2 * (2 * tk) * out_p * 4 <= 0.4 * budget) and (2 * tk < in_f):
            tk *= 2
        num_k = pl.cdiv(in_f, tk)
    # TODO(synk): add N (out) tiling as well for out_f so large that a single
    # (128, out_p) weight tile overflows VMEM.
    in_p = tk * num_k

    w_t = weight.T.astype(compute_dtype)          # (in_f, out_f)
    pad_n = out_p - out_f
    pad_k = in_p - in_f
    if pad_n or pad_k:
        w_t = jnp.pad(w_t, ((0, pad_k), (0, pad_n)))
    b_row = bias.astype(jnp.float32)
    if store_padded and pad_n:
        b_row = jnp.pad(b_row, (0, pad_n))
    b2d = b_row.reshape(1, out_s)

    cfg = _LinearCfg(in_f=in_f, out_f=out_f, in_p=in_p, out_p=out_p,
                     out_s=out_s, tk=tk, num_k=num_k, slice_out=slice_out,
                     compute_dtype=jnp.dtype(compute_dtype).name)
    return w_t, b2d, cfg


# ---------------------------------------------------------------------------
# Forward wrappers
# ---------------------------------------------------------------------------

def _pick_batch_tile(B, cfg, budget):
    """Largest batch tile (multiple of 8, <= 1024) whose footprint — including
    pipeline double-buffering of x, out AND the resident weight — fits budget.
    Guarantees >= 2 batch tiles when B >= 16 (v7x megacore sharding)."""
    bp = 4  # conservative byte estimate (f32), also safe for bf16 inputs
    w_bytes = 2 * cfg.tk * cfg.out_p * bp        # weight tile, double-buffered
    b_bytes = 2 * cfg.out_s * bp                 # bias (tiny)

    def footprint(tb):
        return (w_bytes + b_bytes
                + 2 * tb * cfg.tk * bp           # x tiles, double-buffered
                + 2 * tb * cfg.out_s * bp        # out tiles, double-buffered
                + tb * cfg.out_p * 4)            # f32 accumulator scratch

    tb = 1024
    while tb > 8 and footprint(tb) > budget:
        tb //= 2
    tb = max(tb, 8)
    if B <= tb:
        if B >= 16:
            tb = _round_up(pl.cdiv(B, 2), 8)     # >= 2 grid steps for megacore
        else:
            tb = B                               # single full-extent block
    return tb, footprint(tb)


@functools.partial(jax.jit, static_argnames=("cfg",))
def _linear_forward_prepared(x, w_t, b2d, cfg):
    """x: (B, in_f) -> (B, out_f) f32, using prepared (w_t, b2d, cfg)."""
    B = x.shape[0]
    cdt = jnp.dtype(cfg.compute_dtype)
    if x.dtype != cdt:
        x = x.astype(cdt)
    if cfg.in_p != cfg.in_f:
        # Zero-pad K so partial K blocks never accumulate garbage.
        x = jnp.pad(x, ((0, 0), (0, cfg.in_p - cfg.in_f)))

    budget = _vmem_budget_bytes()
    tb, fp = _pick_batch_tile(B, cfg, budget)
    grid = (pl.cdiv(B, tb), cfg.num_k)

    out = pl.pallas_call(
        _linear_kernel,
        out_shape=jax.ShapeDtypeStruct((B, cfg.out_s), jnp.float32),
        grid=grid,
        in_specs=[
            pl.BlockSpec((tb, cfg.tk), lambda i, k: (i, k)),         # x
            pl.BlockSpec((cfg.tk, cfg.out_p), lambda i, k: (k, 0)),  # weight
            pl.BlockSpec((1, cfg.out_s), lambda i, k: (0, 0)),       # bias
        ],
        out_specs=pl.BlockSpec((tb, cfg.out_s), lambda i, k: (i, 0)),
        scratch_shapes=[pltpu.VMEM((tb, cfg.out_p), jnp.float32)],
        compiler_params=pltpu.CompilerParams(
            dimension_semantics=("parallel", "arbitrary"),
            vmem_limit_bytes=_vmem_limit_bytes(fp)),
    )(x, w_t, b2d)

    if cfg.slice_out:
        out = out[:, :cfg.out_f]
    return out


@jax.jit
def _affine_1x1_forward(x, weight, bias):
    """Lane-dense fast path for in_features == out_features == 1.

    x: (B, 1) -> reshaped/padded to a (R, 128) slab so every load/store uses
    all 128 lanes; w, b ride in SMEM as scalars."""
    B = x.shape[0]
    lanes = 128
    Bp = _round_up(B, 8 * lanes)                 # rows are a multiple of 8
    xf = x.reshape(B)
    if Bp != B:
        xf = jnp.pad(xf, (0, Bp - B))
    R = Bp // lanes
    x_slab = xf.reshape(R, lanes)

    max_tr = 2048
    if R <= 8:
        tr = R
    else:
        n_tiles = max(2, pl.cdiv(R, max_tr))     # >= 2 tiles for v7x megacore
        tr = _round_up(pl.cdiv(R, n_tiles), 8)
    grid = (pl.cdiv(R, tr),)

    w2d = weight.reshape(1, 1).astype(jnp.float32)
    b2d = bias.reshape(1, 1).astype(jnp.float32)

    fp = 4 * tr * lanes * 4                      # x + out, double-buffered
    out_slab = pl.pallas_call(
        _scalar_affine_kernel,
        out_shape=jax.ShapeDtypeStruct((R, lanes), jnp.float32),
        grid=grid,
        in_specs=[
            pl.BlockSpec((1, 1), lambda i: (0, 0),
                         memory_space=pltpu.MemorySpace.SMEM),
            pl.BlockSpec((1, 1), lambda i: (0, 0),
                         memory_space=pltpu.MemorySpace.SMEM),
            pl.BlockSpec((tr, lanes), lambda i: (i, 0)),
        ],
        out_specs=pl.BlockSpec((tr, lanes), lambda i: (i, 0)),
        compiler_params=pltpu.CompilerParams(
            dimension_semantics=("parallel",),
            vmem_limit_bytes=_vmem_limit_bytes(fp)),
    )(w2d, b2d, x_slab)

    return out_slab.reshape(Bp)[:B].reshape(B, 1)


# ---------------------------------------------------------------------------
# Module
# ---------------------------------------------------------------------------

class LR:
    """JAX/Pallas port of the PyTorch LR module (nn.Linear forward)."""

    def __init__(self, input_size, output_size, key, use_bf16=False):
        # Deterministic init matching nn.Linear default: U(-1/sqrt(in), 1/sqrt(in))
        kw, kb = jax.random.split(key)
        bound = 1.0 / (input_size ** 0.5)
        self.weight = jax.random.uniform(
            kw, (output_size, input_size), jnp.float32, -bound, bound)
        self.bias = jax.random.uniform(
            kb, (output_size,), jnp.float32, -bound, bound)
        self.input_size = input_size
        self.output_size = output_size

        # One-time weight prep (transpose + pad) — hoisted out of the forward.
        if input_size == 1 and output_size == 1:
            self._w_t = self._b2d = self._cfg = None
        else:
            cdt = jnp.bfloat16 if use_bf16 else jnp.float32
            self._w_t, self._b2d, self._cfg = prepare_linear_params(
                self.weight, self.bias, cdt)

    def __call__(self, x):
        if self.input_size == 1 and self.output_size == 1:
            return _affine_1x1_forward(x, self.weight, self.bias)
        return _linear_forward_prepared(x, self._w_t, self._b2d, self._cfg)


if __name__ == "__main__":
    key = jax.random.PRNGKey(0)

    # --- 1) Literal chapter case: input_size = output_size = 1 (lane-dense VPU path)
    model = LR(1, 1, key)
    x = jnp.array([[2.0], [3.0]], dtype=jnp.float32)          # (batch=2, in=1)
    out = jax.block_until_ready(model(x))
    ref = x @ model.weight.T + model.bias
    assert out.shape == (2, 1)
    assert jnp.allclose(out, ref, atol=1e-6), (out, ref)

    # --- 2) Small general case: MXU path, out_f < 128 -> unpadded output store
    k2, kx2 = jax.random.split(jax.random.PRNGKey(1))
    model2 = LR(32, 8, k2)
    x2 = jax.random.normal(kx2, (16, 32), jnp.float32)         # (batch=16, in=32)
    out2 = jax.block_until_ready(model2(x2))
    ref2 = x2 @ model2.weight.T + model2.bias
    assert out2.shape == (16, 8)
    assert jnp.allclose(out2, ref2, atol=1e-5), float(jnp.abs(out2 - ref2).max())

    # --- 3) Medium case: out_f > 128 -> lane-padded store + slice, partial batch tile
    k3, kx3 = jax.random.split(jax.random.PRNGKey(2))
    model3 = LR(48, 192, k3)
    x3 = jax.random.normal(kx3, (60, 48), jnp.float32)         # (batch=60, in=48)
    out3 = jax.block_until_ready(model3(x3))
    ref3 = x3 @ model3.weight.T + model3.bias
    assert out3.shape == (60, 192)
    assert jnp.allclose(out3, ref3, atol=1e-4, rtol=1e-4), \
        float(jnp.abs(out3 - ref3).max())

    print("KERNEL_OK")
</pallas_src>

<mosaic_0001>
module attributes {stable_mosaic.version = 11 : i64} {
  func.func @_scalar_affine_kernel(%arg0: i32, %arg1: memref<1x1xf32, #tpu.memory_space<smem>>, %arg2: memref<1x1xf32, #tpu.memory_space<smem>>, %arg3: memref<8x128xf32, #tpu.memory_space<vmem>>, %arg4: memref<8x128xf32, #tpu.memory_space<vmem>>) attributes {dimension_semantics = [#tpu.dimension_semantics<parallel>], iteration_bounds = array<i64: 1>, scalar_prefetch = 0 : i64, scratch_operands = 0 : i64, tpu.core_type = #tpu.core_type<tc>, window_params = [{transform_indices = @transform_0, window_bounds = array<i64: 1, 1>}, {transform_indices = @transform_1, window_bounds = array<i64: 1, 1>}, {transform_indices = @transform_2, window_bounds = array<i64: 8, 128>}, {transform_indices = @transform_3, window_bounds = array<i64: 8, 128>}]} {
    %c0 = arith.constant 0 : index
    %c0_0 = arith.constant 0 : index
    %0 = vector.load %arg3[%c0, %c0_0] : memref<8x128xf32, #tpu.memory_space<vmem>>, vector<8x128xf32>
    %c0_1 = arith.constant 0 : index
    %c0_2 = arith.constant 0 : index
    %1 = memref.load %arg1[%c0_1, %c0_2] : memref<1x1xf32, #tpu.memory_space<smem>>
    %2 = vector.broadcast %1 : f32 to vector<8x128xf32>
    %3 = arith.mulf %0, %2 : vector<8x128xf32>
    %c0_3 = arith.constant 0 : index
    %c0_4 = arith.constant 0 : index
    %4 = memref.load %arg2[%c0_3, %c0_4] : memref<1x1xf32, #tpu.memory_space<smem>>
    %5 = vector.broadcast %4 : f32 to vector<8x128xf32>
    %6 = arith.addf %3, %5 : vector<8x128xf32>
    %c0_5 = arith.constant 0 : index
    %c0_6 = arith.constant 0 : index
    %7 = vector.load %arg4[%c0_5, %c0_6] : memref<8x128xf32, #tpu.memory_space<vmem>>, vector<8x128xf32>
    tpu.vector_store %arg4[%c0_5, %c0_6], %6 {strides = array<i32>} : memref<8x128xf32, #tpu.memory_space<vmem>>, vector<8x128xf32>,
    return
  }
  func.func @transform_0(%arg0: i32) -> (i32, i32) {
    %c0_i32 = arith.constant 0 : i32
    %c0_i32_0 = arith.constant 0 : i32
    %c0_i32_1 = arith.constant 0 : i32
    return %c0_i32, %c0_i32_0 : i32, i32
  }
  func.func @transform_1(%arg0: i32) -> (i32, i32) {
    %c0_i32 = arith.constant 0 : i32
    %c0_i32_0 = arith.constant 0 : i32
    %c0_i32_1 = arith.constant 0 : i32
    return %c0_i32, %c0_i32_0 : i32, i32
  }
  func.func @transform_2(%arg0: i32) -> (i32, i32) {
    %c0_i32 = arith.constant 0 : i32
    %c0_i32_0 = arith.constant 0 : i32
    return %arg0, %c0_i32 : i32, i32
  }
  func.func @transform_3(%arg0: i32) -> (i32, i32) {
    %c0_i32 = arith.constant 0 : i32
    %c0_i32_0 = arith.constant 0 : i32
    return %arg0, %c0_i32 : i32, i32
  }
}

</mosaic_0001>

<bundles_post_ra>
// kernel: _affine_1x1_forward.1
= control target key start
LH: loop header
LB: loop body
LE: loop exit
PB: predicated region body
PF: predicated region fallthrough
CT: control target
= control target key end

     0   :  { %s60_s0 = inlined_call_operand.<no memory space> [shape: f32[1,1], index: 0, kind: input, shape index: {}]   ;;  %s61_s1 = inlined_call_operand.<no memory space> [shape: f32[1,1], index: 1, kind: input, shape index: {}]   ;;  %s62_s2 = inlined_call_operand.vmem [shape: f32[8,128], index: 2, kind: input, shape index: {}]   ;;  %s63_s3 = inlined_call_operand.vmem [shape: f32[8,128], index: 3, kind: output, shape index: {}]  }
   0x1   :  { %v16_v0 = vld [vmem:[%s62_s2] sm:$0xff]  ;;  %v18_v1 = vstv %s60_s0  ;;  %v21_v2 = vstv %s61_s1 }
   0x2   :  { %v19_v3 = vmul.f32 %v18_v1, %v16_v0 }
   0x4   :  { %v22_v4 = vadd.f32 %v21_v2, %v19_v3 }
   0x6   :  { %23 = vst [vmem:[%s63_s3] sm:$0xff] %v22_v4 }

</bundles_post_ra>
